<compile_context>
chip_gen: v6e
topology: v6e:2x2x1
jax: 0.10.0
libtpu: 0.0.40
codegen_flags: <defaults>
</compile_context>

<pallas_src>
import functools

import jax
import jax.numpy as jnp
from jax.experimental import pallas as pl
from jax.experimental.pallas import tpu as pltpu

_HI = jax.lax.Precision.HIGHEST


def _make_divisible(v, divisor, min_value=None):
    if min_value is None:
        min_value = divisor
    new_v = max(min_value, int(v + divisor / 2) // divisor * divisor)
    if new_v < 0.9 * v:
        new_v += divisor
    return new_v


def _choose_batch_tile(batch, per_elem_bytes, target_bytes=4 << 20):
    """Largest divisor of `batch` whose block stays <= target_bytes and,
    when batch >= 2, leaves >= 2 grid steps (both v7x TensorCores busy)."""
    best = 1
    for bt in range(1, batch + 1):
        if batch % bt:
            continue
        if bt * per_elem_bytes > target_bytes:
            continue
        if batch >= 2 and batch // bt < 2:
            continue
        best = bt
    return best


def _se_kernel(x_ref, w1t_ref, b1_ref, w2hc_ref, b2_ref, o_ref, *, inv_hw):
    # x_ref / o_ref: (Bt, C, HW) block.  C on sublanes, HW on lanes.
    # ---- global average pool: f32 accumulation, no full-block upcast ----
    pooled = jnp.sum(x_ref[...], axis=-1, dtype=jnp.float32) * inv_hw      # (Bt, C)

    # ---- FC1 + ReLU: (Bt, C) @ (C, hidden) on the MXU ----
    h = jnp.dot(pooled, w1t_ref[...],
                preferred_element_type=jnp.float32, precision=_HI)
    h = jnp.maximum(h + b1_ref[...], 0.0)                                  # (Bt, hidden)

    # ---- FC2 + h_sigmoid: (Bt, hidden) @ (hidden, C) on the MXU ----
    # (w2 is pre-transposed so the contraction is a plain matmul instead of a
    #  cross-lane XLU reduce over C.)
    y = jnp.dot(h, w2hc_ref[...],
                preferred_element_type=jnp.float32, precision=_HI)
    y = y + b2_ref[...]
    y = jnp.clip(y + 3.0, 0.0, 6.0) * (1.0 / 6.0)                          # (Bt, C)

    # ---- channel-wise scale in the input's native dtype ----
    # TODO(synk): on v5e keep the gate in f32 for the multiply (no bf16 VPU);
    # on v6e/v7x the native-dtype multiply halves vreg pressure for bf16.
    o_ref[...] = x_ref[...] * y[:, :, None].astype(o_ref.dtype)


def se_layer(x, w1, b1, w2, b2):
    """x: (B, C, H, W); w1: (hidden, C), b1: (hidden,),
    w2: (C, hidden), b2: (C,)  (PyTorch nn.Linear conventions)."""
    B, C, H, W = x.shape
    hidden = w1.shape[0]
    HW = H * W
    itemsize = jnp.dtype(x.dtype).itemsize

    x_flat = x.reshape(B, C, HW)

    # Batch grouping: ~1-4 MiB per grid step, >= 2 steps when B allows.
    per_elem_bytes = C * HW * itemsize
    bt = _choose_batch_tile(B, per_elem_bytes)

    # Weight layouts chosen so both FC contractions are plain MXU dots.
    w1t = w1.T.astype(jnp.float32)                   # (C, hidden)
    w2hc = w2.T.astype(jnp.float32)                  # (hidden, C)
    b1r = b1.reshape(1, hidden).astype(jnp.float32)  # (1, hidden)
    b2r = b2.reshape(1, C).astype(jnp.float32)       # (1, C)

    # VMEM budget: double-buffered in+out blocks + double-buffered weights,
    # padded to the (8,128) VMEM tile, capped at 75% of physical VMEM
    # (generation-aware: ~96 MiB on v5e/v6e, ~48 MiB on v7x).
    def rup(v, m):
        return (v + m - 1) // m * m

    block_bytes = bt * rup(C, 8) * rup(HW, 128) * itemsize
    weight_bytes = 4 * (rup(C, 8) * rup(hidden, 128)
                        + rup(hidden, 8) * rup(C, 128)
                        + 8 * rup(hidden, 128)
                        + 8 * rup(C, 128))
    needed = 2 * (2 * block_bytes) + 2 * weight_bytes + (2 << 20)
    try:
        vmem_phys = int(pltpu.get_tpu_info().vmem_capacity_bytes)
    except Exception:
        vmem_phys = 64 << 20   # v7x per-TC VMEM: smallest across generations
    vmem_limit = int(min(max(needed, 8 << 20), (vmem_phys * 3) // 4))

    kernel = functools.partial(_se_kernel, inv_hw=1.0 / float(HW))

    out_flat = pl.pallas_call(
        kernel,
        out_shape=jax.ShapeDtypeStruct((B, C, HW), x.dtype),
        grid_spec=pltpu.PrefetchScalarGridSpec(
            num_scalar_prefetch=0,
            grid=(B // bt,),
            in_specs=[
                pl.BlockSpec((bt, C, HW), lambda b: (b, 0, 0)),
                pl.BlockSpec((C, hidden), lambda b: (0, 0)),
                pl.BlockSpec((1, hidden), lambda b: (0, 0)),
                pl.BlockSpec((hidden, C), lambda b: (0, 0)),
                pl.BlockSpec((1, C), lambda b: (0, 0)),
            ],
            out_specs=pl.BlockSpec((bt, C, HW), lambda b: (b, 0, 0)),
        ),
        compiler_params=pltpu.CompilerParams(
            dimension_semantics=("parallel",),
            vmem_limit_bytes=vmem_limit,
        ),
    )(x_flat, w1t, b1r, w2hc, b2r)

    return out_flat.reshape(B, C, H, W)


def se_layer_ref(x, w1, b1, w2, b2):
    """Pure-JAX reference matching the PyTorch forward (true f32 math)."""
    y = jnp.mean(x.astype(jnp.float32), axis=(2, 3))
    y = jnp.maximum(jnp.dot(y, w1.T.astype(jnp.float32), precision=_HI) + b1, 0.0)
    y = jnp.dot(y, w2.T.astype(jnp.float32), precision=_HI) + b2
    y = jnp.clip(y + 3.0, 0.0, 6.0) / 6.0
    return x * y[:, :, None, None].astype(x.dtype)


if __name__ == "__main__":
    def run_case(B, C, H, W, reduction=4):
        hidden = _make_divisible(C // reduction, 8)
        key = jax.random.PRNGKey(0)
        kx, k1, k2, k3, k4 = jax.random.split(key, 5)
        x = jax.random.normal(kx, (B, C, H, W), dtype=jnp.float32)
        # Deterministic synthetic parameters (PyTorch nn.Linear shapes).
        w1 = jax.random.normal(k1, (hidden, C), dtype=jnp.float32) * 0.1
        b1 = jax.random.normal(k2, (hidden,), dtype=jnp.float32) * 0.1
        w2 = jax.random.normal(k3, (C, hidden), dtype=jnp.float32) * 0.1
        b2 = jax.random.normal(k4, (C,), dtype=jnp.float32) * 0.1

        out = jax.block_until_ready(se_layer(x, w1, b1, w2, b2))
        ref = se_layer_ref(x, w1, b1, w2, b2)
        # Tolerance leaves margin for MXU f32 rounding in the tiny FCs.
        assert jnp.allclose(out, ref, atol=1e-4, rtol=1e-4), \
            f"mismatch vs reference at shape {(B, C, H, W)}"

    # Small demo shape (lane-aligned HW = 256).
    run_case(2, 4, 16, 16)
    # MobileNetV3-like SE stage: HW = 49 is NOT a multiple of 128 -> exercises
    # the no-pad path with masked stores and a real channel count.
    run_case(2, 256, 7, 7)

    print("KERNEL_OK")
</pallas_src>

<mosaic_0001>
module attributes {stable_mosaic.version = 11 : i64} {
  func.func @_se_kernel(%arg0: i32, %arg1: memref<1x4x256xf32, #tpu.memory_space<vmem>>, %arg2: memref<4x8xf32, #tpu.memory_space<vmem>>, %arg3: memref<1x8xf32, #tpu.memory_space<vmem>>, %arg4: memref<8x4xf32, #tpu.memory_space<vmem>>, %arg5: memref<1x4xf32, #tpu.memory_space<vmem>>, %arg6: memref<1x4x256xf32, #tpu.memory_space<vmem>>) attributes {dimension_semantics = [#tpu.dimension_semantics<parallel>], iteration_bounds = array<i64: 2>, scalar_prefetch = 0 : i64, scratch_operands = 0 : i64, tpu.core_type = #tpu.core_type<tc>, window_params = [{transform_indices = @transform_0, window_bounds = array<i64: 1, 4, 256>}, {pipeline_mode = #tpu.pipeline_mode<synchronous>, transform_indices = @transform_1, window_bounds = array<i64: 4, 8>}, {pipeline_mode = #tpu.pipeline_mode<synchronous>, transform_indices = @transform_2, window_bounds = array<i64: 1, 8>}, {pipeline_mode = #tpu.pipeline_mode<synchronous>, transform_indices = @transform_3, window_bounds = array<i64: 8, 4>}, {pipeline_mode = #tpu.pipeline_mode<synchronous>, transform_indices = @transform_4, window_bounds = array<i64: 1, 4>}, {transform_indices = @transform_5, window_bounds = array<i64: 1, 4, 256>}]} {
    %c0 = arith.constant 0 : index
    %c0_0 = arith.constant 0 : index
    %c0_1 = arith.constant 0 : index
    %0 = vector.load %arg1[%c0, %c0_0, %c0_1] : memref<1x4x256xf32, #tpu.memory_space<vmem>>, vector<1x4x256xf32>
    %cst = arith.constant dense<0.000000e+00> : vector<1x4xf32>
    %1 = vector.multi_reduction <add>, %0, %cst [2] : vector<1x4x256xf32> to vector<1x4xf32>
    %cst_2 = arith.constant 3.906250e-03 : f32
    %2 = vector.broadcast %cst_2 : f32 to vector<1x4xf32>
    %3 = arith.mulf %1, %2 : vector<1x4xf32>
    %c0_3 = arith.constant 0 : index
    %c0_4 = arith.constant 0 : index
    %4 = vector.load %arg2[%c0_3, %c0_4] : memref<4x8xf32, #tpu.memory_space<vmem>>, vector<4x8xf32>
    %cst_5 = arith.constant dense<0.000000e+00> : vector<1x8xf32>
    %5 = tpu.matmul %3, %4, %cst_5 {dimension_numbers = #tpu.dot_dimension_numbers<[1], [0], [0], [1], [0, 0, 1, 1], [], []>, precision = #tpu.contract_precision<fp32>} : vector<1x4xf32>, vector<4x8xf32>, vector<1x8xf32> -> vector<1x8xf32>
    %c0_6 = arith.constant 0 : index
    %c0_7 = arith.constant 0 : index
    %6 = vector.load %arg3[%c0_6, %c0_7] : memref<1x8xf32, #tpu.memory_space<vmem>>, vector<1x8xf32>
    %7 = arith.addf %5, %6 : vector<1x8xf32>
    %cst_8 = arith.constant 0.000000e+00 : f32
    %8 = vector.broadcast %cst_8 : f32 to vector<1x8xf32>
    %9 = arith.maximumf %7, %8 : vector<1x8xf32>
    %c0_9 = arith.constant 0 : index
    %c0_10 = arith.constant 0 : index
    %10 = vector.load %arg4[%c0_9, %c0_10] : memref<8x4xf32, #tpu.memory_space<vmem>>, vector<8x4xf32>
    %cst_11 = arith.constant dense<0.000000e+00> : vector<1x4xf32>
    %11 = tpu.matmul %9, %10, %cst_11 {dimension_numbers = #tpu.dot_dimension_numbers<[1], [0], [0], [1], [0, 0, 1, 1], [], []>, precision = #tpu.contract_precision<fp32>} : vector<1x8xf32>, vector<8x4xf32>, vector<1x4xf32> -> vector<1x4xf32>
    %c0_12 = arith.constant 0 : index
    %c0_13 = arith.constant 0 : index
    %12 = vector.load %arg5[%c0_12, %c0_13] : memref<1x4xf32, #tpu.memory_space<vmem>>, vector<1x4xf32>
    %13 = arith.addf %11, %12 : vector<1x4xf32>
    %cst_14 = arith.constant 3.000000e+00 : f32
    %14 = vector.broadcast %cst_14 : f32 to vector<1x4xf32>
    %15 = arith.addf %13, %14 : vector<1x4xf32>
    %cst_15 = arith.constant 0.000000e+00 : f32
    %cst_16 = arith.constant 6.000000e+00 : f32
    %16 = vector.broadcast %cst_15 : f32 to vector<1x4xf32>
    %17 = arith.maximumf %16, %15 : vector<1x4xf32>
    %18 = vector.broadcast %cst_16 : f32 to vector<1x4xf32>
    %19 = arith.minimumf %18, %17 : vector<1x4xf32>
    %cst_17 = arith.constant 0.166666672 : f32
    %20 = vector.broadcast %cst_17 : f32 to vector<1x4xf32>
    %21 = arith.mulf %19, %20 : vector<1x4xf32>
    %c0_18 = arith.constant 0 : index
    %c0_19 = arith.constant 0 : index
    %c0_20 = arith.constant 0 : index
    %22 = vector.load %arg1[%c0_18, %c0_19, %c0_20] : memref<1x4x256xf32, #tpu.memory_space<vmem>>, vector<1x4x256xf32>
    %23 = vector.shape_cast %21 : vector<1x4xf32> to vector<1x4x1xf32>
    %24 = vector.broadcast %23 : vector<1x4x1xf32> to vector<1x4x256xf32>
    %25 = arith.mulf %22, %24 : vector<1x4x256xf32>
    %c0_21 = arith.constant 0 : index
    %c0_22 = arith.constant 0 : index
    %c0_23 = arith.constant 0 : index
    %26 = vector.load %arg6[%c0_21, %c0_22, %c0_23] : memref<1x4x256xf32, #tpu.memory_space<vmem>>, vector<1x4x256xf32>
    tpu.vector_store %arg6[%c0_21, %c0_22, %c0_23], %25 {strides = array<i32>} : memref<1x4x256xf32, #tpu.memory_space<vmem>>, vector<1x4x256xf32>,
    return
  }
  func.func @transform_0(%arg0: i32) -> (i32, i32, i32) {
    %c0_i32 = arith.constant 0 : i32
    %c0_i32_0 = arith.constant 0 : i32
    %c0_i32_1 = arith.constant 0 : i32
    return %arg0, %c0_i32, %c0_i32_0 : i32, i32, i32
  }
  func.func @transform_1(%arg0: i32) -> (i32, i32) {
    %c0_i32 = arith.constant 0 : i32
    %c0_i32_0 = arith.constant 0 : i32
    %c0_i32_1 = arith.constant 0 : i32
    return %c0_i32, %c0_i32_0 : i32, i32
  }
  func.func @transform_2(%arg0: i32) -> (i32, i32) {
    %c0_i32 = arith.constant 0 : i32
    %c0_i32_0 = arith.constant 0 : i32
    %c0_i32_1 = arith.constant 0 : i32
    return %c0_i32, %c0_i32_0 : i32, i32
  }
  func.func @transform_3(%arg0: i32) -> (i32, i32) {
    %c0_i32 = arith.constant 0 : i32
    %c0_i32_0 = arith.constant 0 : i32
    %c0_i32_1 = arith.constant 0 : i32
    return %c0_i32, %c0_i32_0 : i32, i32
  }
  func.func @transform_4(%arg0: i32) -> (i32, i32) {
    %c0_i32 = arith.constant 0 : i32
    %c0_i32_0 = arith.constant 0 : i32
    %c0_i32_1 = arith.constant 0 : i32
    return %c0_i32, %c0_i32_0 : i32, i32
  }
  func.func @transform_5(%arg0: i32) -> (i32, i32, i32) {
    %c0_i32 = arith.constant 0 : i32
    %c0_i32_0 = arith.constant 0 : i32
    %c0_i32_1 = arith.constant 0 : i32
    return %arg0, %c0_i32, %c0_i32_0 : i32, i32, i32
  }
}

</mosaic_0001>

<bundles_post_ra>
// kernel: tpu_custom_call.1
= control target key start
LH: loop header
LB: loop body
LE: loop exit
PB: predicated region body
PF: predicated region fallthrough
CT: control target
= control target key end

     0   :  { %10 = vsyncpa [#allocation3], 0  ;;  %s1756_s0 = inlined_call_operand.hbm [shape: f32[2,4,256], index: 0, kind: input, shape index: {}]   ;;  %s1757_s1 = inlined_call_operand.vmem [shape: f32[4,8], index: 1, kind: input, shape index: {}]   ;;  %s1758_s2 = inlined_call_operand.vmem [shape: f32[1,8], index: 2, kind: input, shape index: {}]   ;;  %s1759_s3 = inlined_call_operand.vmem [shape: f32[8,4], index: 3, kind: input, shape index: {}]   ;;  %s1760_s4 = inlined_call_operand.vmem [shape: f32[1,4], index: 4, kind: input, shape index: {}]   ;;  %s1761_s5 = inlined_call_operand.hbm [shape: f32[2,4,256], index: 5, kind: output, shape index: {}]  }
   0x1   :  { %12 = vsyncpa [#allocation3 + $0x1], 0 }
   0x2   :  { %13 = vsyncpa [#allocation4], 0 }
   0x3   :  { %15 = vsyncpa [#allocation4 + $0x1], 0  ;;  %s1552_s18 = smov 0   ;;  %s1554_s19 = smov 0  }
   0x4   :  { %s1556_s20 = smov 0   ;;  %s1558_s21 = smov 0  }
   0x5 LB: > { %s1573_s22 = sadd.s32 4294967295, %s1515_s21   ;;  %s1273_s23 = sadd.s32 4294967294, %s1515_s21   ;;  %s1515_s21 = sphi %s1558_s21, %s1778_s21   ;;  %s1511_s20 = sphi %s1556_s20, %s1777_s20   ;;  %s1507_s19 = sphi %s1554_s19, %s1776_s19   ;;  %s1503_s18 = sphi %s1552_s18, %s1775_s18  }
   0x6   : > { %s1577_s24 = sadd.s32 1, %s1515_s21   ;;  %s28_s25 = sadd.s32 1, %s1511_s20 }
   0x7   : > { %s25_s26 = ssub.s32 %s1515_s21, %s1577_s24  ;;  %p35_p0 = scmp.ne.s32.totalorder %s1511_s20, %s1507_s19 }
   0x8   : > { %p26_p1 = scmp.eq.s32.totalorder %s25_s26, 0  ;;  %p36_p2 = scmp.eq.s32.totalorder %s1515_s21, 0 }
   0x9   : > { %p41_p3 = scmp.ne.s32.totalorder %s1507_s19, %s1503_s18  ;;  %p42_p4 = scmp.eq.s32.totalorder %s1573_s22, 0 }
   0xa   : > { %s1589_s27 = scalar_select %p26_p1, %s1511_s20, %s28_s25  }
   0xb   : > { %p1591_p5 = por %p36_p2, %p35_p0  ;;  %p1595_p6 = por %p42_p4, %p41_p3 }
   0xc   : > { %p149_p7 = scmp.eq.s32.totalorder %s1573_s22, 1  ;;  %p155_p8 = scmp.eq.s32.totalorder %s1273_s23, 1 }
   0xd   : > { %s1765_s29 = scalar_select %p1595_p6, 1, 0 }
   0xe   : > { %p1385_p10 = scmp.lt.s32.totalorder %s1515_s21, 2  ;;  %p1602_p11 = por %p149_p7, %p35_p0 }
   0xf   : > { %p1606_p12 = por %p155_p8, %p41_p3  ;;  %s187_s7 = sand.u32 1, %s1511_s20  }
  0x10   : > { %s1766_s30 = scalar_select %p1602_p11, 1, 0 }
  0x11   : > { %s1767_s6 = scalar_select %p1606_p12, 1, 0 }
  0x12   : > { %s1287_s8 = sshll.u32 %s1515_s21, 7  ;;  %s1276_s9 = sshll.u32 %s187_s7, 3 }
  0x13   : > { %s1615_s12 = scalar_lea.hbm %s1756_s0, %s1287_s8  ;;  %s191_s13 = scalar_lea.vmem [#allocation2], %s1276_s9 }
  0x14   : > { %s199_s14 = sshll.u32 %s191_s13, 4  ;;  %p1619_p13 = pnand %p1385_p10, %p1591_p5  ;;  %s1623_s14 = int_to_ptr.vmem [resolvable:$true] %s199_s14 }
  0x15   : > { %s188_s16 = scalar_lea.sflag [#allocation3], %s187_s7  ;;  %s1423_s17 = scalar_lea.hbm %s1615_s12, 128 }
  0x16   : > { %p1424_p2 = scmp.ne.s32.totalorder %s1615_s12, %s1423_s17  ;;  %p1425_p3 = pneg %p1619_p13 }
  0x17   : > { %s1428_s26 = scalar_lea.hbm %s1756_s0, 256  ;;  %p1429_p5 = scmp.lt.s32.totalorder %s1615_s12, %s1756_s0 }
  0x18   : > { %p1426_p4 = pnand %p1425_p3, %p1424_p2  ;;  %p1430_p8 = scmp.lt.s32.totalorder %s1428_s26, %s1423_s17 }
  0x1a   : > { %p1427_p7 = pneg %p1426_p4  ;;  %p1431_p10 = por %p1430_p8, %p1429_p5 }
  0x1c   : > { %p1432_p9 = pnand %p1431_p10, %p1427_p7 }
  0x1e   : > { %1435 = shalt.err (!%p1432_p9)
}
  0x1f   : > { %s1436_s7 = scalar_lea.vmem %s1623_s14, 128  ;;  %s1517_s9 = smov [#allocation2]  }
  0x20   : > { %p1437_p0 = scmp.ne.s32.totalorder %s1623_s14, %s1436_s7  ;;  %s1441_s10 = sshll.u32 %s1517_s9, 4  ;;  %s1442_s10 = int_to_ptr.vmem [resolvable:$false] %s1441_s10 }
  0x21   : > { %s1443_s11 = scalar_lea.vmem %s1442_s10, 256  ;;  %p1444_p4 = scmp.lt.s32.totalorder %s1623_s14, %s1442_s10 }
  0x22   : > { %p1439_p1 = pnand %p1437_p0, %p1425_p3  ;;  %p1445_p12 = scmp.lt.s32.totalorder %s1443_s11, %s1436_s7 }
  0x24   : > { %p1440_p2 = pneg %p1439_p1  ;;  %p1446_p11 = por %p1445_p12, %p1444_p4 }
  0x26   : > { %p1447_p6 = pnand %p1446_p11, %p1440_p2 }
  0x28   : > { %1450 = shalt.err (!%p1447_p6)
}
  0x29   : > { %1380 = dma.hbm_to_vmem [thread:$0]  (!%p1619_p13), %s1615_s12, 128, %s1623_s14, %s188_s16  }
  0x2a   : > { %p1769_p9 = scmp.lt.s32.totalorder %s1515_s21, 3  ;;  %p1770_p7 = scmp.ge.s32.totalorder %s1515_s21, 1 }
  0x2c   : > { %p205_p0 = pnand %p1770_p7, %p1769_p9 }
  0x2d   : > { %s1650_s13 = sand.u32 (!%p205_p0), 1, %s1507_s19   ;;  %p1771_p6 = scmp.ne.s32.totalorder (!%p205_p0), %s1765_s29, 0 }
  0x2e   : > { %208 = sbr.rel (%p205_p0) target bundleno = 776 (0x308), region = 40  ;;  %s1280_s17 = sshll.u32 (!%p205_p0), %s1650_s13, 3 }
  0x2f   : > { %s211_s23 = scalar_lea.sflag (!%p205_p0), [#allocation3], %s1650_s13  ;;  %s214_s15 = scalar_lea.vmem (!%p205_p0), [#allocation2], %s1280_s17 }
  0x33   : > { %1494 = dma.done.wait (%p1771_p6), %s211_s23, 128  }
  0x34   : > { %1496 = vsyncadd (%p1771_p6), %s211_s23, 4294967168  ;;  %vm245_vm0 = vcmask 1043456   ;;  %v1660_v0 = vld [vmem:[%s214_s15] sm:$0xff]  ;;  %v1518_v12 = vmov 0.0   ;;  %vm1519_vm1 = vmmov 0   ;;  %v255_v13 = vlaneseq  ;;  %s1288_s7 = sshll.u32 %s1573_s22, 7 }
  0x35   : > { %v243_v1 = vcombine.high %v1660_v0, %v1660_v0  ;;  %v246_v2 = vsel %vm245_vm0, %v1660_v0, 0.0  ;;  %v252_v5 = vld [vmem:[%s1757_s1] sm:$0xf]  ;;  %1318 = vmatprep.subr.mxu1 %v1518_v12  ;;  %1313 = vmatprep.subr.mxu0 %v1518_v12  ;;  %vm261_vm2 = vcmask 31744   ;;  %vm716_vm3 = vcmask 64512   ;;  %s240_s9 = scalar_lea.vmem [#allocation5], %s1280_s17  ;;  %s1201_s15 = scalar_lea.hbm %s1761_s5, %s1288_s7 }
  0x36   : > { %v265_v6 = vsel %vm245_vm0, %v252_v5, 0  ;;  %1320 = vmatprep.mubr.msk.f32.mxu1 %vm1519_vm1, %v1518_v12  ;;  %1315 = vmatprep.mubr.msk.f32.mxu0 %vm1519_vm1, %v1518_v12  ;;  %v256_v14 = vand.u32 127, %v255_v13  ;;  %v1676_v15 = vshrl.u32 %v255_v13, 7  ;;  %v714_v26 = vld [vmem:[%s1759_s3] sm:$0xff]  ;;  %s1203_s10 = sshll.u32 %s240_s9, 4  ;;  %s1189_s12 = scalar_lea.sflag [#allocation4], %s1650_s13  ;;  %s1204_s10 = int_to_ptr.vmem [resolvable:$true] %s1203_s10 }
  0x37   : > { %v247_v3 = vsel %vm245_vm0, %v243_v1, 0.0  ;;  %v298_v7 = vand.u32 4294901760, %v265_v6  ;;  %v751_v27 = vand.u32 4294901760, %v714_v26  ;;  %v253_v36 = vld [vmem:[%s1758_s2] sm:$0x1]  ;;  %s1451_s14 = scalar_lea.vmem %s1204_s10, 128 }
  0x38   : > { %v248_v4 = vadd.f32 %v247_v3, %v246_v2  ;;  %v259_v16 = vsub.s32 %v256_v14, %v1676_v15  ;;  %v715_v62 = vld [vmem:[%s1760_s4] sm:$0x1]  ;;  %p1452_p11 = scmp.ne.s32.totalorder %s1204_s10, %s1451_s14  ;;  %p1772_p12 = scmp.ne.s32.totalorder %s1766_s30, 0 }
  0x39   : > { %v375_v8 = vsub.f32 %v265_v6, %v298_v7  ;;  %1314 = vmatpush3.msra.mxu0 %v298_v7  ;;  %v828_v28 = vsub.f32 %v714_v26, %v751_v27  ;;  %s1521_s29 = smov [#allocation5]  }
  0x3a   : > { %249 = vadd.xlane.f32.xlu0 %v248_v4  ;;  %1323 = vmatprep.subr.mxu0 %v1518_v12  ;;  %p1453_p13 = pnand %p1452_p11, %p1772_p12  ;;  %s1455_s22 = sshll.u32 %s1521_s29, 4  ;;  %s1456_s22 = int_to_ptr.vmem [resolvable:$false] %s1455_s22 }
  0x3b   : > { %v376_v9 = vand.u32 4294901760, %v375_v8  ;;  %v829_v29 = vand.u32 4294901760, %v828_v28  ;;  %s1457_s17 = scalar_lea.vmem %s1456_s22, 256  ;;  %p1458_p3 = scmp.lt.s32.totalorder %s1204_s10, %s1456_s22 }
  0x3c   : > { %p1454_p1 = pneg %p1453_p13  ;;  %p1459_p5 = scmp.lt.s32.totalorder %s1457_s17, %s1451_s14 }
  0x3d   : > { %v377_v10 = vsub.f32 %v375_v8, %v376_v9  ;;  %v830_v30 = vsub.f32 %v828_v28, %v829_v29 }
  0x3e   : > { %p1460_p8 = por %p1459_p5, %p1458_p3 }
  0x3f   : > { %v378_v11 = vand.u32 4294901760, %v377_v10  ;;  %v831_v31 = vand.u32 4294901760, %v830_v30 }
  0x40   : > { %p1461_p10 = pnand %p1460_p8, %p1454_p1 }
  0x41   : > { %1319 = vmatpush3.msra.mxu1 %v378_v11 }
  0x42   : > { %1328 = vmatprep.subr.mxu1 %v1518_v12 }
  0xc3   : > { %v250_v17 = vpop.xlane.xlu0 %249 }
  0xc4   : > { %v251_v18 = vmul.f32 0.00390625, %v250_v17 }
  0xc6   : > { %v260_v19 = vrot.slane %v251_v18, %v259_v16  ;;  %v1172_v18 = vsub.s32 0, %v1676_v15 }
  0xc8   : > { %v262_v20 = vsel %vm261_vm2, %v260_v19, 0 }
  0xc9   : > { %v333_v21 = vand.u32 4294901760, %v262_v20 }
  0xcb   : > { %v334_v22 = vsub.f32 %v262_v20, %v333_v21  ;;  %1321 = vmatmul.mubr.f32.vlgmr.msra.gmra.mxu1 %v333_v21 }
  0xcc   : > { %1329 = vmatpush3.msra.mxu1 %v298_v7  ;;  %1330 = vmatprep.mubr.msk.f32.mxu1 %vm1519_vm1, %v1518_v12 }
  0xcd   : > { %v335_v23 = vand.u32 4294901760, %v334_v22  ;;  %1338 = vmatprep.subr.mxu1 %v1518_v12 }
  0xcf   : > { %1331 = vmatmul.mubr.f32.vlgmr.msra.gmra.mxu1 %v335_v23  ;;  %v336_v24 = vsub.f32 %v334_v22, %v335_v23 }
  0xd0   : > { %1339 = vmatpush3.msra.mxu1 %v298_v7  ;;  %1340 = vmatprep.mubr.msk.f32.mxu1 %vm1519_vm1, %v1518_v12 }
  0xd1   : > { %v337_v25 = vand.u32 4294901760, %v336_v24  ;;  %1348 = vmatprep.subr.mxu1 %v1518_v12 }
  0xd3   : > { %1316 = vmatmul.mubr.f32.vlgmr.msra.gmra.mxu0 %v337_v25  ;;  %1341 = vmatmul.mubr.f32.vlgmr.msra.gmra.mxu1 %v333_v21 }
  0xd4   : > { %1324 = vmatpush3.msra.mxu0 %v375_v8  ;;  %1325 = vmatprep.mubr.msk.f32.mxu0 %vm1519_vm1, %v1518_v12 }
  0xd5   : > { %1333 = vmatprep.subr.mxu0 %v1518_v12  ;;  %1350 = vmatprep.mubr.msk.f32.mxu1 %vm1519_vm1, %v1518_v12 }
  0xd6   : > { %1349 = vmatpush3.msra.mxu1 %v831_v31 }
  0xd7   : > { %1326 = vmatmul.mubr.f32.vlgmr.msra.gmra.mxu0 %v334_v22  ;;  %1358 = vmatprep.subr.mxu1 %v1518_v12 }
  0xd8   : > { %1334 = vmatpush3.msra.mxu0 %v376_v9  ;;  %1335 = vmatprep.mubr.msk.f32.mxu0 %vm1519_vm1, %v1518_v12 }
  0xd9   : > { %1343 = vmatprep.subr.mxu0 %v1518_v12 }
  0xdb   : > { %1336 = vmatmul.mubr.f32.vlgmr.msra.gmra.mxu0 %v333_v21  ;;  %v1520_v21 = vmov 839922192  }
  0xdc   : > { %1345 = vmatprep.mubr.msk.f32.mxu0 %vm1519_vm1, %v1518_v12  ;;  %1344 = vmatpush3.msra.mxu0 %v751_v27  ;;  %v1179_v22 = vunpack.c.l.s4 %v1520_v21 }
  0xdd   : > { %1353 = vmatprep.subr.mxu0 %v1518_v12 }
  0xde   : > { %v1180_v23 = vunpack.c.0.s8 %v1179_v22 }
  0xe0   : > { %v1183_v24 = vsub.s32 %v1180_v23, %v1676_v15 }
 0x18b   : > { %v415_v32 = vpop.f32.mrf.mxu1 }
 0x18d   : > { %v1322_v33 = vpop.f32.mrf.mxu1 }
 0x18f   : > { %v563_v34 = vpop.f32.mrf.mxu1 }
 0x191   : > { %v1332_v35 = vpop.f32.mrf.mxu1 }
 0x193   : > { %v339_v37 = vpop.f32.mrf.mxu0  ;;  %v709_v38 = vpop.f32.mrf.mxu1 }
 0x194   : > { %v340_v39 = vadd.f32 %v339_v37, %v253_v36 }
 0x195   : > { %v1317_v40 = vpop.f32.mrf.mxu0  ;;  %v1342_v41 = vpop.f32.mrf.mxu1 }
 0x196   : > { %v416_v42 = vadd.f32 %v415_v32, %v340_v39 }
 0x197   : > { %v489_v43 = vpop.f32.mrf.mxu0 }
 0x198   : > { %v490_v44 = vadd.f32 %v489_v43, %v416_v42 }
 0x199   : > { %v1327_v45 = vpop.f32.mrf.mxu0 }
 0x19a   : > { %v564_v46 = vadd.f32 %v563_v34, %v490_v44 }
 0x19b   : > { %v637_v47 = vpop.f32.mrf.mxu0 }
 0x19c   : > { %v638_v48 = vadd.f32 %v637_v47, %v564_v46 }
 0x19d   : > { %v1337_v49 = vpop.f32.mrf.mxu0 }
 0x19e   : > { %v710_v50 = vadd.f32 %v709_v38, %v638_v48 }
 0x1a0   : > { %v713_v51 = vmax.f32 %v710_v50, 0.0 }
 0x1a2   : > { %v718_v52 = vsel %vm716_vm3, %v713_v51, 0 }
 0x1a3   : > { %v786_v53 = vand.u32 4294901760, %v718_v52 }
 0x1a5   : > { %v787_v54 = vsub.f32 %v718_v52, %v786_v53  ;;  %1351 = vmatmul.mubr.f32.vlgmr.msra.gmra.mxu1 %v786_v53 }
 0x1a6   : > { %1359 = vmatpush3.msra.mxu1 %v751_v27  ;;  %1360 = vmatprep.mubr.msk.f32.mxu1 %vm1519_vm1, %v1518_v12 }
 0x1a7   : > { %v788_v55 = vand.u32 4294901760, %v787_v54  ;;  %1368 = vmatprep.subr.mxu1 %v1518_v12 }
 0x1a9   : > { %1361 = vmatmul.mubr.f32.vlgmr.msra.gmra.mxu1 %v788_v55  ;;  %v789_v56 = vsub.f32 %v787_v54, %v788_v55 }
 0x1aa   : > { %1369 = vmatpush3.msra.mxu1 %v751_v27  ;;  %1370 = vmatprep.mubr.msk.f32.mxu1 %vm1519_vm1, %v1518_v12 }
 0x1ab   : > { %v790_v57 = vand.u32 4294901760, %v789_v56 }
 0x1ad   : > { %1346 = vmatmul.mubr.f32.vlgmr.msra.gmra.mxu0 %v790_v57  ;;  %1371 = vmatmul.mubr.f32.vlgmr.msra.gmra.mxu1 %v786_v53 }
 0x1ae   : > { %1354 = vmatpush3.msra.mxu0 %v828_v28  ;;  %1355 = vmatprep.mubr.msk.f32.mxu0 %vm1519_vm1, %v1518_v12 }
 0x1af   : > { %1363 = vmatprep.subr.mxu0 %v1518_v12 }
 0x1b1   : > { %1356 = vmatmul.mubr.f32.vlgmr.msra.gmra.mxu0 %v787_v54 }
 0x1b2   : > { %1364 = vmatpush3.msra.mxu0 %v829_v29  ;;  %1365 = vmatprep.mubr.msk.f32.mxu0 %vm1519_vm1, %v1518_v12 }
 0x1b5   : > { %1366 = vmatmul.mubr.f32.vlgmr.msra.gmra.mxu0 %v786_v53 }
 0x265   : > { %v868_v58 = vpop.f32.mrf.mxu1 }
 0x267   : > { %v1352_v59 = vpop.f32.mrf.mxu1 }
 0x269   : > { %v1016_v60 = vpop.f32.mrf.mxu1 }
 0x26b   : > { %v1362_v61 = vpop.f32.mrf.mxu1 }
 0x26d   : > { %v792_v63 = vpop.f32.mrf.mxu0  ;;  %v1162_v1 = vpop.f32.mrf.mxu1 }
 0x26e   : > { %v793_v2 = vadd.f32 %v792_v63, %v715_v62 }
 0x26f   : > { %v1347_v3 = vpop.f32.mrf.mxu0  ;;  %v1372_v4 = vpop.f32.mrf.mxu1 }
 0x270   : > { %v869_v5 = vadd.f32 %v868_v58, %v793_v2 }
 0x271   : > { %v942_v6 = vpop.f32.mrf.mxu0 }
 0x272   : > { %v943_v7 = vadd.f32 %v942_v6, %v869_v5 }
 0x273   : > { %v1357_v8 = vpop.f32.mrf.mxu0 }
 0x274   : > { %v1017_v9 = vadd.f32 %v1016_v60, %v943_v7 }
 0x275   : > { %v1090_v10 = vpop.f32.mrf.mxu0 }
 0x276   : > { %v1091_v11 = vadd.f32 %v1090_v10, %v1017_v9 }
 0x277   : > { %v1367_v12 = vpop.f32.mrf.mxu0 }
 0x278   : > { %v1163_v13 = vadd.f32 %v1162_v1, %v1091_v11 }
 0x27a   : > { %v1166_v14 = vadd.f32 3.0, %v1163_v13 }
 0x27c   : > { %v1167_v16 = vmax.f32 %v1166_v14, 0.0 }
 0x27e   : > { %v1168_v17 = vmin.f32 %v1167_v16, 6.0 }
 0x280   : > { %v1169_v19 = vmul.f32 0.16666667, %v1168_v17 }
 0x282   : > { %v1173_v20 = vrot.slane %v1169_v19, %v1172_v18 }
 0x284   : > { %1175 = vbcast.lane.b32.xlu0 %v1173_v20, 256 }
 0x2f6   : > { %v1176_v25 = vpop.permute.xlu0 %1175 }
 0x2f7   : > { %v1184_v26 = vrot.slane %v1176_v25, %v1183_v24 }
 0x2f9   : > { %v1186_v27 = vmul.f32 %v1184_v26, %v1660_v0 }
 0x2fb   : > { %1187 = vst [vmem:[%s240_s9] sm:$0xff] %v1186_v27 }
 0x2fc   : > { %1464 = shalt.err (!%p1461_p10)
}
 0x2fd   : > { %s1465_s16 = scalar_lea.hbm %s1201_s15, 128  ;;  %s1469_s26 = scalar_lea.hbm %s1761_s5, 256 }
 0x2fe   : > { %p1466_p2 = scmp.ne.s32.totalorder %s1201_s15, %s1465_s16  ;;  %p1470_p7 = scmp.lt.s32.totalorder %s1201_s15, %s1761_s5 }
 0x2ff   : > { %p1471_p0 = scmp.lt.s32.totalorder %s1469_s26, %s1465_s16 }
 0x300   : > { %p1467_p4 = pnand %p1466_p2, %p1772_p12 }
 0x301   : > { %p1472_p6 = por %p1471_p0, %p1470_p7 }
 0x302   : > { %p1468_p9 = pneg %p1467_p4 }
 0x304   : > { %p1473_p11 = pnand %p1472_p6, %p1468_p9 }
 0x306   : > { %1476 = shalt.err (!%p1473_p11)
}
 0x307   : > { %1375 = dma.vmem_to_hbm [thread:$0]  (%p1772_p12), %s1204_s10, 128, %s1201_s15, %s1189_s12  }
 0x308 PF: > { %s1215_s7 = sand.u32 1, %s1503_s18   ;;  %p1773_p13 = scmp.ne.s32.totalorder %s1767_s6, 0 }
 0x309   : > { %p1774_p1 = scmp.ge.s32.totalorder %s1515_s21, 2  ;;  %s1216_s9 = scalar_lea.sflag [#allocation4], %s1215_s7 }
 0x30b   : > { %p1382_p3 = pnand %p1774_p1, %p1773_p13 }
 0x30d   : > { %p1383_p5 = pneg %p1382_p3 }
 0x30f   : > { %1498 = dma.done.wait (%p1383_p5), %s1216_s9, 128  }
 0x310   : > { %1500 = vsyncadd (%p1383_p5), %s1216_s9, 4294967168  ;;  %p18_p8 = scmp.ge.s32.totalorder %s1577_s24, 4   ;;  %s1775_s18 = smov %s1507_s19 }
 0x311   : > { %s1776_s19 = smov %s1511_s20  ;;  %s1777_s20 = smov %s1589_s27 }
 0x312   : > { %s1778_s21 = smov %s1577_s24  ;;  %20 = sbr.rel (!%p18_p8) target bundleno = 5 (0x5), region = 85 }
 0x317   :  { %1221 = vsyncpa [#allocation3], 1 }
 0x318   :  { %1223 = vsyncpa [#allocation3 + $0x1], 1 }
 0x319   :  { %1224 = vsyncpa [#allocation4], 1 }
 0x31a   :  { %1226 = vsyncpa [#allocation4 + $0x1], 1 }

</bundles_post_ra>
